<compile_context>
chip_gen: v7x
topology: tpu7x:2x2x1
jax: 0.10.0
libtpu: 0.0.40
codegen_flags: <defaults>
</compile_context>

<pallas_src>
import functools

import jax
import jax.numpy as jnp
from jax.experimental import pallas as pl
from jax.experimental.pallas import tpu as pltpu


def _pick_tile(d, n, budget_bytes=48 * 1024 * 1024):
    """Largest MXU-friendly tile (multiple of 256/128) dividing D that fits VMEM."""
    for t in (512, 256, 128):
        if d % t == 0:
            # 2 inputs x 2 pipeline buffers x (N, t) f32 blocks
            # + ~3 (t, t) f32 temporaries (c, c^2, masked) + stat rows.
            need = 2 * 2 * 4 * n * t + 3 * 4 * t * t + 8 * 4 * t
            if need <= budget_bytes:
                return t
    return d  # fall back to a single untiled block along D (small-D case)


def _stats_kernel(z1_ref, z2_ref, m1_ref, s1_ref, m2_ref, s2_ref):
    n = z1_ref.shape[0]
    z1 = z1_ref[...].astype(jnp.float32)
    z2 = z2_ref[...].astype(jnp.float32)

    inv_n = jnp.float32(1.0 / n)
    mean1 = jnp.sum(z1, axis=0, keepdims=True) * inv_n
    mean2 = jnp.sum(z2, axis=0, keepdims=True) * inv_n
    zc1 = z1 - mean1
    zc2 = z2 - mean2

    # scale = 1 / (std * sqrt(N)), unbiased std (ddof=1), via rsqrt (EUP slot).
    # Zero-variance columns give inf/NaN exactly like the PyTorch reference.
    k = jnp.float32(n) / jnp.float32(n - 1)
    m1_ref[...] = mean1
    m2_ref[...] = mean2
    s1_ref[...] = jax.lax.rsqrt(jnp.sum(zc1 * zc1, axis=0, keepdims=True) * k)
    s2_ref[...] = jax.lax.rsqrt(jnp.sum(zc2 * zc2, axis=0, keepdims=True) * k)


def _corr_kernel(z1_ref, z2_ref, m1_ref, s1_ref, m2_ref, s2_ref,
                 loss_ref, acc_ref, *, lambda_bt):
    i = pl.program_id(0)
    j = pl.program_id(1)

    @pl.when((i == 0) & (j == 0))
    def _init():
        acc_ref[0] = jnp.float32(0.0)

    # Apply the precomputed column normalization to this tile only.
    z1n = (z1_ref[...].astype(jnp.float32) - m1_ref[...]) * s1_ref[...]
    z2n = (z2_ref[...].astype(jnp.float32) - m2_ref[...]) * s2_ref[...]

    # Contract over N (axis 0 of both operands): feeds the MXU in the native
    # (N, T) lane-major layout, no transposed copy through the XLU.
    # Scales already include 1/sqrt(N), so this is the final c tile.
    c = jax.lax.dot_general(
        z1n, z2n,
        dimension_numbers=(((0,), (0,)), ((), ())),
        preferred_element_type=jnp.float32,
    )
    csq = c * c

    # Off-diagonal term handled implicitly:
    #   loss = lambda * sum(c^2) + sum_diag[(1 - lambda) c_ii^2 - 2 c_ii + 1]
    acc_ref[0] += jnp.float32(lambda_bt) * jnp.sum(csq)

    @pl.when(i == j)  # Ti == Tj, so the global diagonal lives only in i == j tiles
    def _diag():
        t = c.shape[0]
        row = jax.lax.broadcasted_iota(jnp.int32, c.shape, 0)
        col = jax.lax.broadcasted_iota(jnp.int32, c.shape, 1)
        eq = row == col
        d_sq = jnp.sum(jnp.where(eq, csq, 0.0))
        d_sum = jnp.sum(jnp.where(eq, c, 0.0))
        acc_ref[0] += (jnp.float32(1.0 - lambda_bt) * d_sq
                       - jnp.float32(2.0) * d_sum
                       + jnp.float32(t))

    @pl.when((i == pl.num_programs(0) - 1) & (j == pl.num_programs(1) - 1))
    def _store():
        loss_ref[0, 0] = acc_ref[0]


def barlow_twins_loss(z1, z2, lambda_bt: float = 0.005):
    """Pallas implementation of BarlowTwins.forward(z1, z2) -> scalar loss."""
    assert z1.shape == z2.shape and z1.ndim == 2
    n, d = z1.shape
    t = _pick_tile(d, n)
    gd = d // t

    # Pass 1: per-column normalization statistics (mean, 1/(std*sqrt(N))).
    stat_shape = jax.ShapeDtypeStruct((1, d), jnp.float32)
    m1, s1, m2, s2 = pl.pallas_call(
        _stats_kernel,
        out_shape=(stat_shape, stat_shape, stat_shape, stat_shape),
        grid_spec=pltpu.PrefetchScalarGridSpec(
            num_scalar_prefetch=0,
            grid=(gd,),
            in_specs=[
                pl.BlockSpec((n, t), lambda i: (0, i)),
                pl.BlockSpec((n, t), lambda i: (0, i)),
            ],
            out_specs=[pl.BlockSpec((1, t), lambda i: (0, i))] * 4,
        ),
        compiler_params=pltpu.CompilerParams(
            dimension_semantics=("parallel",),
            vmem_limit_bytes=64 * 1024 * 1024,
        ),
    )(z1, z2)

    # Pass 2: tiled cross-correlation + scalar loss accumulation.
    kernel = functools.partial(_corr_kernel, lambda_bt=float(lambda_bt))
    loss = pl.pallas_call(
        kernel,
        out_shape=jax.ShapeDtypeStruct((1, 1), jnp.float32),
        grid_spec=pltpu.PrefetchScalarGridSpec(
            num_scalar_prefetch=0,
            grid=(gd, gd),  # j innermost: the z1 block stays resident across j
            in_specs=[
                pl.BlockSpec((n, t), lambda i, j: (0, i)),
                pl.BlockSpec((n, t), lambda i, j: (0, j)),
                pl.BlockSpec((1, t), lambda i, j: (0, i)),
                pl.BlockSpec((1, t), lambda i, j: (0, i)),
                pl.BlockSpec((1, t), lambda i, j: (0, j)),
                pl.BlockSpec((1, t), lambda i, j: (0, j)),
            ],
            out_specs=pl.BlockSpec((1, 1), lambda i, j: (0, 0),
                                   memory_space=pltpu.MemorySpace.SMEM),
            scratch_shapes=[pltpu.SMEM((1,), jnp.float32)],
        ),
        compiler_params=pltpu.CompilerParams(
            # The scalar loss is reduced across the whole grid in SMEM scratch,
            # so both axes must execute sequentially ("arbitrary").
            # TODO(synk): for v7x megacore, emit per-tile partial sums as a
            # blocked output and mark both axes "parallel" instead.
            dimension_semantics=("arbitrary", "arbitrary"),
            vmem_limit_bytes=64 * 1024 * 1024,
        ),
    )(z1, z2, m1, s1, m2, s2)
    return loss[0, 0]


def _reference_loss(z1, z2, lambda_bt: float = 0.005):
    # Plain-JAX reference mirroring the PyTorch module (std with ddof=1).
    n, d = z1.shape
    z1n = (z1 - z1.mean(0)) / jnp.std(z1, axis=0, ddof=1)
    z2n = (z2 - z2.mean(0)) / jnp.std(z2, axis=0, ddof=1)
    c = z1n.T @ z2n / n
    on_diag = jnp.sum((jnp.diag(c) - 1.0) ** 2)
    off_diag = jnp.sum(c ** 2) - jnp.sum(jnp.diag(c) ** 2)
    return on_diag + lambda_bt * off_diag


if __name__ == "__main__":
    key = jax.random.PRNGKey(0)
    k1, k2 = jax.random.split(key)
    N, D = 8, 32  # small (batch, projector-dim) consistent with the module
    z1 = jax.random.normal(k1, (N, D), dtype=jnp.float32)
    z2 = jax.random.normal(k2, (N, D), dtype=jnp.float32)

    loss = barlow_twins_loss(z1, z2, lambda_bt=0.005)
    loss = jax.block_until_ready(loss)

    ref = _reference_loss(z1, z2, lambda_bt=0.005)
    assert jnp.allclose(loss, ref, rtol=1e-4, atol=1e-4), (loss, ref)

    print("KERNEL_OK")
</pallas_src>

<mosaic_0001>
module attributes {stable_mosaic.version = 11 : i64} {
  func.func @_stats_kernel(%arg0: i32, %arg1: memref<8x32xf32, #tpu.memory_space<vmem>>, %arg2: memref<8x32xf32, #tpu.memory_space<vmem>>, %arg3: memref<1x32xf32, #tpu.memory_space<vmem>>, %arg4: memref<1x32xf32, #tpu.memory_space<vmem>>, %arg5: memref<1x32xf32, #tpu.memory_space<vmem>>, %arg6: memref<1x32xf32, #tpu.memory_space<vmem>>) attributes {dimension_semantics = [#tpu.dimension_semantics<parallel>], iteration_bounds = array<i64: 1>, scalar_prefetch = 0 : i64, scratch_operands = 0 : i64, tpu.core_type = #tpu.core_type<tc>, window_params = [{transform_indices = @transform_0, window_bounds = array<i64: 8, 32>}, {transform_indices = @transform_1, window_bounds = array<i64: 8, 32>}, {transform_indices = @transform_2, window_bounds = array<i64: 1, 32>}, {transform_indices = @transform_3, window_bounds = array<i64: 1, 32>}, {transform_indices = @transform_4, window_bounds = array<i64: 1, 32>}, {transform_indices = @transform_5, window_bounds = array<i64: 1, 32>}]} {
    %c0 = arith.constant 0 : index
    %c0_0 = arith.constant 0 : index
    %0 = vector.load %arg1[%c0, %c0_0] : memref<8x32xf32, #tpu.memory_space<vmem>>, vector<8x32xf32>
    %c0_1 = arith.constant 0 : index
    %c0_2 = arith.constant 0 : index
    %1 = vector.load %arg2[%c0_1, %c0_2] : memref<8x32xf32, #tpu.memory_space<vmem>>, vector<8x32xf32>
    %cst = arith.constant dense<0.000000e+00> : vector<32xf32>
    %2 = vector.multi_reduction <add>, %0, %cst [0] : vector<8x32xf32> to vector<32xf32>
    %3 = vector.shape_cast %2 : vector<32xf32> to vector<1x32xf32>
    %cst_3 = arith.constant 1.250000e-01 : f32
    %4 = vector.broadcast %cst_3 : f32 to vector<1x32xf32>
    %5 = arith.mulf %3, %4 : vector<1x32xf32>
    %cst_4 = arith.constant dense<0.000000e+00> : vector<32xf32>
    %6 = vector.multi_reduction <add>, %1, %cst_4 [0] : vector<8x32xf32> to vector<32xf32>
    %7 = vector.shape_cast %6 : vector<32xf32> to vector<1x32xf32>
    %cst_5 = arith.constant 1.250000e-01 : f32
    %8 = vector.broadcast %cst_5 : f32 to vector<1x32xf32>
    %9 = arith.mulf %7, %8 : vector<1x32xf32>
    %10 = vector.broadcast %5 : vector<1x32xf32> to vector<8x32xf32>
    %11 = arith.subf %0, %10 : vector<8x32xf32>
    %12 = vector.broadcast %9 : vector<1x32xf32> to vector<8x32xf32>
    %13 = arith.subf %1, %12 : vector<8x32xf32>
    %cst_6 = arith.constant 8.000000e+00 : f32
    %cst_7 = arith.constant 7.000000e+00 : f32
    %14 = arith.divf %cst_6, %cst_7 : f32
    %c0_8 = arith.constant 0 : index
    %c0_9 = arith.constant 0 : index
    %15 = vector.load %arg3[%c0_8, %c0_9] : memref<1x32xf32, #tpu.memory_space<vmem>>, vector<1x32xf32>
    tpu.vector_store %arg3[%c0_8, %c0_9], %5 {strides = array<i32>} : memref<1x32xf32, #tpu.memory_space<vmem>>, vector<1x32xf32>,
    %c0_10 = arith.constant 0 : index
    %c0_11 = arith.constant 0 : index
    %16 = vector.load %arg5[%c0_10, %c0_11] : memref<1x32xf32, #tpu.memory_space<vmem>>, vector<1x32xf32>
    tpu.vector_store %arg5[%c0_10, %c0_11], %9 {strides = array<i32>} : memref<1x32xf32, #tpu.memory_space<vmem>>, vector<1x32xf32>,
    %17 = arith.mulf %11, %11 : vector<8x32xf32>
    %cst_12 = arith.constant dense<0.000000e+00> : vector<32xf32>
    %18 = vector.multi_reduction <add>, %17, %cst_12 [0] : vector<8x32xf32> to vector<32xf32>
    %19 = vector.shape_cast %18 : vector<32xf32> to vector<1x32xf32>
    %20 = vector.broadcast %14 : f32 to vector<1x32xf32>
    %21 = arith.mulf %19, %20 : vector<1x32xf32>
    %22 = math.rsqrt %21 : vector<1x32xf32>
    %c0_13 = arith.constant 0 : index
    %c0_14 = arith.constant 0 : index
    %23 = vector.load %arg4[%c0_13, %c0_14] : memref<1x32xf32, #tpu.memory_space<vmem>>, vector<1x32xf32>
    tpu.vector_store %arg4[%c0_13, %c0_14], %22 {strides = array<i32>} : memref<1x32xf32, #tpu.memory_space<vmem>>, vector<1x32xf32>,
    %24 = arith.mulf %13, %13 : vector<8x32xf32>
    %cst_15 = arith.constant dense<0.000000e+00> : vector<32xf32>
    %25 = vector.multi_reduction <add>, %24, %cst_15 [0] : vector<8x32xf32> to vector<32xf32>
    %26 = vector.shape_cast %25 : vector<32xf32> to vector<1x32xf32>
    %27 = vector.broadcast %14 : f32 to vector<1x32xf32>
    %28 = arith.mulf %26, %27 : vector<1x32xf32>
    %29 = math.rsqrt %28 : vector<1x32xf32>
    %c0_16 = arith.constant 0 : index
    %c0_17 = arith.constant 0 : index
    %30 = vector.load %arg6[%c0_16, %c0_17] : memref<1x32xf32, #tpu.memory_space<vmem>>, vector<1x32xf32>
    tpu.vector_store %arg6[%c0_16, %c0_17], %29 {strides = array<i32>} : memref<1x32xf32, #tpu.memory_space<vmem>>, vector<1x32xf32>,
    return
  }
  func.func @transform_0(%arg0: i32) -> (i32, i32) {
    %c0_i32 = arith.constant 0 : i32
    %c0_i32_0 = arith.constant 0 : i32
    return %c0_i32, %arg0 : i32, i32
  }
  func.func @transform_1(%arg0: i32) -> (i32, i32) {
    %c0_i32 = arith.constant 0 : i32
    %c0_i32_0 = arith.constant 0 : i32
    return %c0_i32, %arg0 : i32, i32
  }
  func.func @transform_2(%arg0: i32) -> (i32, i32) {
    %c0_i32 = arith.constant 0 : i32
    %c0_i32_0 = arith.constant 0 : i32
    return %c0_i32, %arg0 : i32, i32
  }
  func.func @transform_3(%arg0: i32) -> (i32, i32) {
    %c0_i32 = arith.constant 0 : i32
    %c0_i32_0 = arith.constant 0 : i32
    return %c0_i32, %arg0 : i32, i32
  }
  func.func @transform_4(%arg0: i32) -> (i32, i32) {
    %c0_i32 = arith.constant 0 : i32
    %c0_i32_0 = arith.constant 0 : i32
    return %c0_i32, %arg0 : i32, i32
  }
  func.func @transform_5(%arg0: i32) -> (i32, i32) {
    %c0_i32 = arith.constant 0 : i32
    %c0_i32_0 = arith.constant 0 : i32
    return %c0_i32, %arg0 : i32, i32
  }
}

</mosaic_0001>

<bundles_post_ra>
// kernel: tpu_custom_call.1
= control target key start
LH: loop header
LB: loop body
LE: loop exit
PB: predicated region body
PF: predicated region fallthrough
CT: control target
= control target key end

     0   :  { %11 = vsyncpa [#allocation3], 0  ;;  %s429_s0 = inlined_call_operand.hbm [shape: f32[8,32], index: 0, kind: input, shape index: {}]   ;;  %s430_s1 = inlined_call_operand.hbm [shape: f32[8,32], index: 1, kind: input, shape index: {}]   ;;  %s431_s2 = inlined_call_operand.hbm [shape: f32[1,32], index: 2, kind: output, shape index: {0}]   ;;  %s432_s3 = inlined_call_operand.hbm [shape: f32[1,32], index: 3, kind: output, shape index: {1}]   ;;  %s433_s4 = inlined_call_operand.hbm [shape: f32[1,32], index: 4, kind: output, shape index: {2}]   ;;  %s434_s5 = inlined_call_operand.hbm [shape: f32[1,32], index: 5, kind: output, shape index: {3}]  }
   0x1   :  { %12 = vsyncpa [#allocation6], 0 }
   0x2   :  { %13 = vsyncpa [#allocation4], 0 }
   0x3   :  { %14 = vsyncpa [#allocation9], 0 }
   0x4   :  { %15 = vsyncpa [#allocation12], 0  ;;  %s297_s18 = smov [#allocation2]   ;;  %s298_s20 = smov [#allocation5]  }
   0x5   :  { %s22_s19 = sshll.u32 %s297_s18, 4  ;;  %s32_s21 = sshll.u32 %s298_s20, 4  ;;  %s23_s19 = int_to_ptr.vmem [resolvable:$true] %s22_s19  ;;  %s33_s21 = int_to_ptr.vmem [resolvable:$true] %s32_s21 }
   0x6   :  { %s155_s24 = scalar_lea.hbm %s429_s0, 128 }
   0x7   :  { %p156_p0 = scmp.ne.s32.totalorder %s429_s0, %s155_s24  ;;  %p159_p1 = scmp.lt.u32.totalorder %s155_s24, %s429_s0 }
   0x9   :  { %p161_p2 = pnand %p159_p1, %p156_p0 }
   0xb   :  { %164 = shalt.err (!%p161_p2)
}
   0xc   :  { %s165_s29 = scalar_lea.vmem %s23_s19, 128  ;;  %p170_p4 = scmp.lt.s32.totalorder %s23_s19, %s23_s19 }
   0xd   :  { %p166_p3 = scmp.ne.s32.totalorder %s23_s19, %s165_s29  ;;  %p171_p5 = scmp.lt.s32.totalorder %s165_s29, %s165_s29 }
   0xf   :  { %p172_p6 = por %p171_p5, %p170_p4 }
  0x11   :  { %p173_p7 = pnand %p172_p6, %p166_p3 }
  0x13   :  { %176 = shalt.err (!%p173_p7)
}
  0x14   :  { %25 = dma.hbm_to_vmem [thread:$0]  %s429_s0, 128, %s23_s19, [#allocation3]  }
  0x15   :  { %s177_s9 = scalar_lea.hbm %s430_s1, 128 }
  0x16   :  { %p178_p8 = scmp.ne.s32.totalorder %s430_s1, %s177_s9  ;;  %p181_p9 = scmp.lt.u32.totalorder %s177_s9, %s430_s1 }
  0x18   :  { %p183_p10 = pnand %p181_p9, %p178_p8 }
  0x1a   :  { %186 = shalt.err (!%p183_p10)
}
  0x1b   :  { %s187_s14 = scalar_lea.vmem %s33_s21, 128  ;;  %p192_p12 = scmp.lt.s32.totalorder %s33_s21, %s33_s21 }
  0x1c   :  { %p188_p11 = scmp.ne.s32.totalorder %s33_s21, %s187_s14  ;;  %p193_p13 = scmp.lt.s32.totalorder %s187_s14, %s187_s14 }
  0x1e   :  { %p194_p0 = por %p193_p13, %p192_p12 }
  0x20   :  { %p195_p1 = pnand %p194_p0, %p188_p11 }
  0x22   :  { %198 = shalt.err (!%p195_p1)
}
  0x23   :  { %35 = dma.hbm_to_vmem [thread:$0]  %s430_s1, 128, %s33_s21, [#allocation6]  }
  0x24   :  { %287 = dma.done.wait [#allocation3], 128  }
  0x25   :  { %288 = vsyncadd [#allocation3], 4294967168 }
  0x26   :  { %289 = dma.done.wait [#allocation6], 128  }
  0x27   :  { %290 = vsyncadd [#allocation6], 4294967168  ;;  %vm44_vm0 = vcmask 261120   ;;  %v42_v0 = vld [vmem:[#allocation2] sm:$0xff]  ;;  %v43_v1 = vld [vmem:[#allocation5] sm:$0xff]  ;;  %s299_s1 = smov [#allocation7]  }
  0x28   :  { %v45_v2 = vsel %vm44_vm0, %v42_v0, 0.0  ;;  %v53_v3 = vsel %vm44_vm0, %v43_v1, 0.0  ;;  %s94_s16 = sshll.u32 %s299_s1, 4  ;;  %vm63_vm1 = vcmask 253952   ;;  %s95_s16 = int_to_ptr.vmem [resolvable:$true] %s94_s16 }
  0x29   :  { %v46_v4 = vrot.slane %v45_v2, 4  ;;  %v54_v5 = vrot.slane %v53_v3, 4  ;;  %s199_s17 = scalar_lea.vmem %s95_s16, 16  ;;  %s203_s18 = scalar_lea.vmem %s95_s16, 32 }
  0x2a   :  { %p200_p2 = scmp.ne.s32.totalorder %s95_s16, %s199_s17  ;;  %p204_p3 = scmp.lt.s32.totalorder %s95_s16, %s95_s16 }
  0x2b   :  { %v47_v6 = vadd.f32 %v46_v4, %v45_v2  ;;  %v55_v7 = vadd.f32 %v54_v5, %v53_v3  ;;  %p205_p4 = scmp.lt.s32.totalorder %s203_s18, %s199_s17 }
  0x2d   :  { %v48_v8 = vrot.slane %v47_v6, 2  ;;  %v56_v9 = vrot.slane %v55_v7, 2  ;;  %p206_p5 = por %p205_p4, %p204_p3 }
  0x2f   :  { %v49_v10 = vadd.f32 %v48_v8, %v47_v6  ;;  %v57_v11 = vadd.f32 %v56_v9, %v55_v7  ;;  %p207_p6 = pnand %p206_p5, %p200_p2 }
  0x31   :  { %v50_v12 = vrot.slane %v49_v10, 1  ;;  %v58_v13 = vrot.slane %v57_v11, 1 }
  0x33   :  { %v51_v14 = vadd.f32 %v50_v12, %v49_v10  ;;  %v59_v15 = vadd.f32 %v58_v13, %v57_v11 }
  0x35   :  { %v52_v16 = vmul.f32 0.125, %v51_v14  ;;  %v60_v17 = vmul.f32 0.125, %v59_v15 }
  0x37   :  { %v61_v18 = vsub.f32 %v42_v0, %v52_v16  ;;  %64 = vst.msk [vmem:[#allocation7] sm:$0x1] %vm63_vm1, %v52_v16  ;;  %v62_v19 = vsub.f32 %v43_v1, %v60_v17  ;;  %65 = vst.msk [vmem:[#allocation10] sm:$0x1] %vm63_vm1, %v60_v17 }
  0x38   :  { %210 = shalt.err (!%p207_p6)
}
  0x39   :  { %s211_s21 = scalar_lea.hbm %s431_s2, 16 }
  0x3a   :  { %p212_p7 = scmp.ne.s32.totalorder %s431_s2, %s211_s21  ;;  %p215_p8 = scmp.lt.u32.totalorder %s211_s21, %s431_s2 }
  0x3c   :  { %p217_p9 = pnand %p215_p8, %p212_p7 }
  0x3e   :  { %220 = shalt.err (!%p217_p9)
}
  0x3f   :  { %97 = dma.vmem_to_hbm [thread:$0]  %s95_s16, 16, %s431_s2, [#allocation4]   ;;  %v66_v20 = vmul.f32 %v61_v18, %v61_v18  ;;  %v77_v21 = vmul.f32 %v62_v19, %v62_v19 }
  0x40   :  { %s300_s2 = smov [#allocation8]   ;;  %s301_s29 = smov [#allocation10]  }
  0x41   :  { %v67_v22 = vsel %vm44_vm0, %v66_v20, 0.0  ;;  %v78_v23 = vsel %vm44_vm0, %v77_v21, 0.0  ;;  %s104_s28 = sshll.u32 %s300_s2, 4  ;;  %s114_s30 = sshll.u32 %s301_s29, 4  ;;  %s105_s28 = int_to_ptr.vmem [resolvable:$true] %s104_s28  ;;  %s375_s30 = int_to_ptr.vmem [resolvable:$true] %s114_s30 }
  0x42   :  { %v68_v24 = vrot.slane %v67_v22, 4  ;;  %v79_v25 = vrot.slane %v78_v23, 4  ;;  %s302_s6 = smov [#allocation11]   ;;  %s221_s8 = scalar_lea.vmem %s105_s28, 16 }
  0x43   :  { %s124_s7 = sshll.u32 %s302_s6, 4  ;;  %p222_p10 = scmp.ne.s32.totalorder %s105_s28, %s221_s8  ;;  %s378_s7 = int_to_ptr.vmem [resolvable:$true] %s124_s7 }
  0x44   :  { %v69_v26 = vadd.f32 %v68_v24, %v67_v22  ;;  %v80_v27 = vadd.f32 %v79_v25, %v78_v23  ;;  %s225_s9 = scalar_lea.vmem %s105_s28, 32  ;;  %p226_p11 = scmp.lt.s32.totalorder %s105_s28, %s105_s28 }
  0x45   :  { %p227_p12 = scmp.lt.s32.totalorder %s225_s9, %s221_s8 }
  0x46   :  { %v70_v28 = vrot.slane %v69_v26, 2  ;;  %v81_v29 = vrot.slane %v80_v27, 2 }
  0x47   :  { %p228_p13 = por %p227_p12, %p226_p11 }
  0x48   :  { %v71_v30 = vadd.f32 %v70_v28, %v69_v26  ;;  %v82_v31 = vadd.f32 %v81_v29, %v80_v27 }
  0x49   :  { %p229_p0 = pnand %p228_p13, %p222_p10 }
  0x4a   :  { %v72_v32 = vrot.slane %v71_v30, 1  ;;  %v83_v33 = vrot.slane %v82_v31, 1 }
  0x4c   :  { %v73_v34 = vadd.f32 %v72_v32, %v71_v30  ;;  %v84_v35 = vadd.f32 %v83_v33, %v82_v31 }
  0x4e   :  { %v74_v36 = vmul.f32 1.1428572, %v73_v34  ;;  %v85_v37 = vmul.f32 1.1428572, %v84_v35 }
  0x50   :  { %151 = vrsqrt.f32 %v74_v36 }
  0x51   :  { %153 = vrsqrt.f32 %v85_v37 }
  0x5a   :  { %v152_v38 = vpop.eup %151 }
  0x5b   :  { %v154_v39 = vpop.eup %153  ;;  %76 = vst.msk [vmem:[#allocation8] sm:$0x1] %vm63_vm1, %v152_v38 }
  0x5c   :  { %87 = vst.msk [vmem:[#allocation11] sm:$0x1] %vm63_vm1, %v154_v39 }
  0x5d   :  { %232 = shalt.err (!%p229_p0)
}
  0x5e   :  { %s233_s12 = scalar_lea.hbm %s432_s3, 16 }
  0x5f   :  { %p234_p1 = scmp.ne.s32.totalorder %s432_s3, %s233_s12  ;;  %p237_p2 = scmp.lt.u32.totalorder %s233_s12, %s432_s3 }
  0x61   :  { %p239_p3 = pnand %p237_p2, %p234_p1 }
  0x63   :  { %242 = shalt.err (!%p239_p3)
}
  0x64   :  { %107 = dma.vmem_to_hbm [thread:$0]  %s105_s28, 16, %s432_s3, [#allocation9]  }
  0x65   :  { %s243_s17 = scalar_lea.vmem %s375_s30, 16  ;;  %s247_s18 = scalar_lea.vmem %s375_s30, 32 }
  0x66   :  { %p244_p4 = scmp.ne.s32.totalorder %s375_s30, %s243_s17  ;;  %p248_p5 = scmp.lt.s32.totalorder %s375_s30, %s375_s30 }
  0x67   :  { %p249_p6 = scmp.lt.s32.totalorder %s247_s18, %s243_s17 }
  0x69   :  { %p250_p7 = por %p249_p6, %p248_p5 }
  0x6b   :  { %p251_p8 = pnand %p250_p7, %p244_p4 }
  0x6d   :  { %254 = shalt.err (!%p251_p8)
}
  0x6e   :  { %s255_s21 = scalar_lea.hbm %s433_s4, 16 }
  0x6f   :  { %p256_p9 = scmp.ne.s32.totalorder %s433_s4, %s255_s21  ;;  %p259_p10 = scmp.lt.u32.totalorder %s255_s21, %s433_s4 }
  0x71   :  { %p261_p11 = pnand %p259_p10, %p256_p9 }
  0x73   :  { %264 = shalt.err (!%p261_p11)
}
  0x74   :  { %117 = dma.vmem_to_hbm [thread:$0]  %s375_s30, 16, %s433_s4, [#allocation9]  }
  0x75   :  { %s265_s27 = scalar_lea.vmem %s378_s7, 16  ;;  %s269_s2 = scalar_lea.vmem %s378_s7, 32 }
  0x76   :  { %p266_p12 = scmp.ne.s32.totalorder %s378_s7, %s265_s27  ;;  %p270_p13 = scmp.lt.s32.totalorder %s378_s7, %s378_s7 }
  0x77   :  { %p271_p0 = scmp.lt.s32.totalorder %s269_s2, %s265_s27 }
  0x79   :  { %p272_p1 = por %p271_p0, %p270_p13 }
  0x7b   :  { %p273_p2 = pnand %p272_p1, %p266_p12 }
  0x7d   :  { %276 = shalt.err (!%p273_p2)
}
  0x7e   :  { %s277_s6 = scalar_lea.hbm %s434_s5, 16 }
  0x7f   :  { %p278_p3 = scmp.ne.s32.totalorder %s434_s5, %s277_s6  ;;  %p281_p4 = scmp.lt.u32.totalorder %s277_s6, %s434_s5 }
  0x81   :  { %p283_p5 = pnand %p281_p4, %p278_p3 }
  0x83   :  { %286 = shalt.err (!%p283_p5)
}
  0x84   :  { %127 = dma.vmem_to_hbm [thread:$0]  %s378_s7, 16, %s434_s5, [#allocation12]  }
  0x85   :  { %291 = dma.done.wait [#allocation4], 16  }
  0x86   :  { %292 = vsyncadd [#allocation4], 4294967280 }
  0x87   :  { %293 = dma.done.wait [#allocation9], 32  }
  0x88   :  { %294 = vsyncadd [#allocation9], 4294967264 }
  0x89   :  { %295 = dma.done.wait [#allocation12], 16  }
  0x8a   :  { %296 = vsyncadd [#allocation12], 4294967280 }
  0x8b   :  { %140 = vsyncpa [#allocation3], 1 }
  0x8c   :  { %141 = vsyncpa [#allocation6], 1 }
  0x8d   :  { %142 = vsyncpa [#allocation4], 1 }
  0x8e   :  { %143 = vsyncpa [#allocation9], 1 }
  0x8f   :  { %144 = vsyncpa [#allocation12], 1 }

</bundles_post_ra>
